<compile_context>
chip_gen: v6e
topology: v6e:2x2x1
jax: 0.10.0
libtpu: 0.0.40
codegen_flags: <defaults>
</compile_context>

<pallas_src>
import functools

import jax
import jax.numpy as jnp
from jax.experimental import pallas as pl
from jax.experimental.pallas import tpu as pltpu


# ---------------------------------------------------------------------------
# Kernels
# ---------------------------------------------------------------------------

def _scale_norm_kernel(scale_ref, x_ref, o_ref, *, eps, out_mul_f32):
    """Single-pass ScaleNorm: full `hidden` per block."""
    x = x_ref[...]
    xf = x.astype(jnp.float32)
    # clamp(sumsq, eps^2) == clamp(norm, eps) (sqrt monotone, eps > 0);
    # rsqrt goes to the EUP slot, effectively free under DMA.
    sumsq = jnp.sum(xf * xf, axis=-1, keepdims=True)
    inv_norm = jax.lax.rsqrt(jnp.maximum(sumsq, eps * eps))
    factor = scale_ref[0, 0] * inv_norm               # (tile_rows, 1) f32
    if out_mul_f32:
        o_ref[...] = (xf * factor).astype(o_ref.dtype)
    else:
        # bf16/f16 inputs: keep f32 only for the reduction; multiply in the
        # native dtype so no full-tile f32 copy is materialized for the store.
        o_ref[...] = x * factor.astype(o_ref.dtype)


def _sumsq_chunk_kernel(x_ref, ss_ref, *, hidden, chunk, mask_last):
    """Pass 1 of the huge-hidden fallback: accumulate sum(x^2) over chunks."""
    j = pl.program_id(1)

    @pl.when(j == 0)
    def _():
        ss_ref[...] = jnp.zeros_like(ss_ref)

    x = x_ref[...].astype(jnp.float32)
    if mask_last:
        # Mask out-of-range lanes of the partial last hidden chunk.
        col = jax.lax.broadcasted_iota(jnp.int32, x.shape, 1) + j * chunk
        x = jnp.where(col < hidden, x, 0.0)
    ss_ref[...] += jnp.sum(x * x, axis=-1, keepdims=True)


def _apply_chunk_kernel(scale_ref, ss_ref, x_ref, o_ref, *, eps, out_mul_f32):
    """Pass 2 of the huge-hidden fallback: out = x * scale * rsqrt(clamp(sumsq))."""
    inv_norm = jax.lax.rsqrt(jnp.maximum(ss_ref[...], eps * eps))
    factor = scale_ref[0, 0] * inv_norm
    if out_mul_f32:
        o_ref[...] = (x_ref[...].astype(jnp.float32) * factor).astype(o_ref.dtype)
    else:
        o_ref[...] = x_ref[...] * factor.astype(o_ref.dtype)


# ---------------------------------------------------------------------------
# Tiling helpers
# ---------------------------------------------------------------------------

def _round_up(n, m):
    return ((n + m - 1) // m) * m


def _sublane_multiple(dtype):
    itemsize = jnp.dtype(dtype).itemsize
    # f32 -> 8, bf16/f16 -> 16, int8/fp8 -> 32 rows per packed sublane group.
    return {4: 8, 2: 16, 1: 32}.get(itemsize, 8)


def _target_tile_bytes(dtype):
    # 6 MiB per buffer for 32-bit inputs; 4 MiB for 16/8-bit inputs (whose f32
    # sumsq intermediate roughly doubles in-flight bytes).  Double-buffered
    # in+out plus temps stays ~32-40 MiB: inside v7x's 64 MiB physical VMEM and
    # far inside v5e/v6e's 128 MiB.
    return (6 << 20) if jnp.dtype(dtype).itemsize >= 4 else (4 << 20)


def _vmem_limit_bytes(tile_rows, tile_cols, dtype):
    itemsize = jnp.dtype(dtype).itemsize
    tile_bytes = tile_rows * tile_cols * itemsize
    f32_bytes = tile_rows * tile_cols * 4
    # 2x double-buffered input + 2x double-buffered output + ~2 f32 temps
    # + fixed margin for compiler-internal scratch.  Clamp to [32, 40] MiB so
    # v7x (64 MiB physical) always keeps headroom.
    est = 4 * tile_bytes + 2 * f32_bytes + (4 << 20)
    return int(min(max(est, 32 << 20), 40 << 20))


def _pick_tile_rows(rows, hidden, dtype, target_tile_bytes):
    """Byte-budgeted row tile (not row-count-capped)."""
    itemsize = jnp.dtype(dtype).itemsize
    sub = _sublane_multiple(dtype)
    row_bytes = max(1, hidden * itemsize)
    rows_rounded = _round_up(rows, sub)
    # Cap by tile *bytes*: per-grid-step overhead (~0.35 us) is amortized by
    # bytes, so small hidden sizes still get multi-MiB tiles.
    tr = max(1, target_tile_bytes // row_bytes)
    tr = max(sub, (tr // sub) * sub)
    tr = min(tr, rows_rounded)
    # Megacore balance guard: prefer >= 8 grid steps (keeps both v7x
    # TensorCores busy, incl. the partial last block) as long as tiles stay
    # >= 2 MiB; negligible overhead delta on single-TC v5e/v6e.
    steps = (rows_rounded + tr - 1) // tr
    if steps < 8:
        tr_split = _round_up(max(1, -(-rows_rounded // 8)), sub)
        if tr_split * row_bytes >= (2 << 20):
            tr = min(tr, tr_split)
    return max(tr, sub)


# ---------------------------------------------------------------------------
# Wrapper
# ---------------------------------------------------------------------------

def scale_norm(x, scale, eps=1e-5, tile_rows=None, hidden_chunk=None):
    """Apply ScaleNorm along the last axis of x using Pallas TPU kernels."""
    orig_shape = x.shape
    hidden = orig_shape[-1]
    rows = 1
    for d in orig_shape[:-1]:
        rows *= d

    x2d = x.reshape(rows, hidden)
    dtype = x.dtype
    itemsize = jnp.dtype(dtype).itemsize
    sub = _sublane_multiple(dtype)
    target = _target_tile_bytes(dtype)
    out_mul_f32 = itemsize >= 4

    scale_arr = jnp.asarray(scale, dtype=jnp.float32).reshape(1, 1)
    eps = float(eps)

    # Huge-hidden guard: if even a minimum-height (sub-row) full-hidden tile
    # blows well past the per-buffer budget, use the two-pass hidden-chunked
    # pipeline instead of risking a VMEM over-commit / compile failure.
    use_chunked = hidden_chunk is not None or (sub * hidden * itemsize > 2 * target)

    if not use_chunked:
        tr = tile_rows if tile_rows is not None else _pick_tile_rows(
            rows, hidden, dtype, target)
        kernel = functools.partial(
            _scale_norm_kernel, eps=eps, out_mul_f32=out_mul_f32)
        # TODO(synk): for hidden < 128 (toy shapes) stores are lane-masked; a
        # lane-dense repack (fold k rows into lanes + segmented reduction) only
        # pays off there — real transformer hiddens are multiples of 128.
        out2d = pl.pallas_call(
            kernel,
            out_shape=jax.ShapeDtypeStruct((rows, hidden), dtype),
            grid_spec=pltpu.PrefetchScalarGridSpec(
                num_scalar_prefetch=0,
                grid=(pl.cdiv(rows, tr),),
                in_specs=[
                    pl.BlockSpec(memory_space=pltpu.MemorySpace.SMEM),  # scale
                    pl.BlockSpec((tr, hidden), lambda i: (i, 0)),
                ],
                out_specs=pl.BlockSpec((tr, hidden), lambda i: (i, 0)),
            ),
            compiler_params=pltpu.CompilerParams(
                # "parallel" lets Mosaic shard the row axis across TensorCores
                # on megacore parts (v7x); the >=8-step guard keeps both fed.
                dimension_semantics=("parallel",),
                vmem_limit_bytes=_vmem_limit_bytes(tr, hidden, dtype),
            ),
        )(scale_arr, x2d)
        return out2d.reshape(orig_shape)

    # ---- two-pass hidden-chunked fallback (very large hidden) ----
    chunk = hidden_chunk
    if chunk is None:
        chunk = max(128, ((target // (sub * itemsize)) // 128) * 128)
    chunk = int(min(chunk, _round_up(hidden, 128)))
    if tile_rows is None:
        tr = max(sub, ((target // max(1, chunk * itemsize)) // sub) * sub)
        tr = min(tr, _round_up(rows, sub))
    else:
        tr = tile_rows
    row_tiles = pl.cdiv(rows, tr)
    hchunks = pl.cdiv(hidden, chunk)
    vmem_limit = _vmem_limit_bytes(tr, chunk, dtype)

    ss = pl.pallas_call(
        functools.partial(_sumsq_chunk_kernel, hidden=hidden, chunk=chunk,
                          mask_last=(hidden % chunk) != 0),
        out_shape=jax.ShapeDtypeStruct((rows, 1), jnp.float32),
        grid_spec=pltpu.PrefetchScalarGridSpec(
            num_scalar_prefetch=0,
            grid=(row_tiles, hchunks),
            in_specs=[pl.BlockSpec((tr, chunk), lambda i, j: (i, j))],
            out_specs=pl.BlockSpec((tr, 1), lambda i, j: (i, 0)),  # accumulator
        ),
        compiler_params=pltpu.CompilerParams(
            dimension_semantics=("parallel", "arbitrary"),
            vmem_limit_bytes=vmem_limit,
        ),
    )(x2d)

    out2d = pl.pallas_call(
        functools.partial(_apply_chunk_kernel, eps=eps, out_mul_f32=out_mul_f32),
        out_shape=jax.ShapeDtypeStruct((rows, hidden), dtype),
        grid_spec=pltpu.PrefetchScalarGridSpec(
            num_scalar_prefetch=0,
            grid=(row_tiles, hchunks),
            in_specs=[
                pl.BlockSpec(memory_space=pltpu.MemorySpace.SMEM),   # scale
                pl.BlockSpec((tr, 1), lambda i, j: (i, 0)),          # sumsq
                pl.BlockSpec((tr, chunk), lambda i, j: (i, j)),      # x
            ],
            out_specs=pl.BlockSpec((tr, chunk), lambda i, j: (i, j)),
        ),
        compiler_params=pltpu.CompilerParams(
            dimension_semantics=("parallel", "parallel"),
            vmem_limit_bytes=vmem_limit,
        ),
    )(scale_arr, ss, x2d)
    return out2d.reshape(orig_shape)


if __name__ == "__main__":
    key = jax.random.PRNGKey(0)
    k1, k2, k3 = jax.random.split(key, 3)
    eps = 1e-5

    # 1) Main path: transformer-style toy shape (batch, seq, hidden), f32.
    batch, seq, hidden = 2, 8, 32
    x = jax.random.normal(k1, (batch, seq, hidden), dtype=jnp.float32)
    scale_param = jnp.float32(hidden ** 0.5)
    out = jax.block_until_ready(scale_norm(x, scale_param, eps))
    norm = jnp.maximum(jnp.linalg.norm(x, axis=-1, keepdims=True), eps)
    ref = x * (scale_param / norm)
    assert out.shape == x.shape
    assert jnp.allclose(out, ref, atol=1e-5, rtol=1e-5)

    # 2) bf16 path (f32 reduction, native-dtype output multiply).
    xb = jax.random.normal(k2, (2, 8, 128), dtype=jnp.float32).astype(jnp.bfloat16)
    scale_b = jnp.float32(128 ** 0.5)
    out_b = jax.block_until_ready(scale_norm(xb, scale_b, eps))
    xbf = xb.astype(jnp.float32)
    norm_b = jnp.maximum(jnp.linalg.norm(xbf, axis=-1, keepdims=True), eps)
    ref_b = xbf * (scale_b / norm_b)
    assert out_b.dtype == jnp.bfloat16
    assert jnp.allclose(out_b.astype(jnp.float32), ref_b, atol=5e-2, rtol=5e-2)

    # 3) Hidden-chunked two-pass fallback, forced at a small shape so the
    #    partial-chunk masking (320 = 256 + 64) is actually exercised.
    xc = jax.random.normal(k3, (64, 320), dtype=jnp.float32)
    scale_c = jnp.float32(320 ** 0.5)
    out_c = jax.block_until_ready(
        scale_norm(xc, scale_c, eps, tile_rows=32, hidden_chunk=256))
    norm_c = jnp.maximum(jnp.linalg.norm(xc, axis=-1, keepdims=True), eps)
    ref_c = xc * (scale_c / norm_c)
    assert jnp.allclose(out_c, ref_c, atol=1e-5, rtol=1e-5)

    print("KERNEL_OK")
</pallas_src>

<mosaic_0001>
module attributes {stable_mosaic.version = 11 : i64} {
  func.func @_scale_norm_kernel(%arg0: i32, %arg1: memref<1x1xf32, #tpu.memory_space<smem>>, %arg2: memref<16x32xf32, #tpu.memory_space<vmem>>, %arg3: memref<16x32xf32, #tpu.memory_space<vmem>>) attributes {dimension_semantics = [#tpu.dimension_semantics<parallel>], iteration_bounds = array<i64: 1>, scalar_prefetch = 0 : i64, scratch_operands = 0 : i64, tpu.core_type = #tpu.core_type<tc>, window_params = [{transform_indices = @transform_0, window_bounds = array<i64: 1, 1>}, {transform_indices = @transform_1, window_bounds = array<i64: 16, 32>}, {transform_indices = @transform_2, window_bounds = array<i64: 16, 32>}]} {
    %c0 = arith.constant 0 : index
    %c0_0 = arith.constant 0 : index
    %0 = vector.load %arg2[%c0, %c0_0] : memref<16x32xf32, #tpu.memory_space<vmem>>, vector<16x32xf32>
    %1 = arith.mulf %0, %0 : vector<16x32xf32>
    %cst = arith.constant dense<0.000000e+00> : vector<16xf32>
    %2 = vector.multi_reduction <add>, %1, %cst [1] : vector<16x32xf32> to vector<16xf32>
    %3 = vector.shape_cast %2 : vector<16xf32> to vector<16x1xf32>
    %cst_1 = arith.constant 1.000000e-10 : f32
    %4 = vector.broadcast %cst_1 : f32 to vector<16x1xf32>
    %5 = arith.maximumf %3, %4 : vector<16x1xf32>
    %6 = math.rsqrt %5 : vector<16x1xf32>
    %c0_2 = arith.constant 0 : index
    %c0_3 = arith.constant 0 : index
    %7 = memref.load %arg1[%c0_2, %c0_3] : memref<1x1xf32, #tpu.memory_space<smem>>
    %8 = vector.broadcast %7 : f32 to vector<16x1xf32>
    %9 = arith.mulf %8, %6 : vector<16x1xf32>
    %10 = vector.broadcast %9 : vector<16x1xf32> to vector<16x32xf32>
    %11 = arith.mulf %0, %10 : vector<16x32xf32>
    %c0_4 = arith.constant 0 : index
    %c0_5 = arith.constant 0 : index
    %12 = vector.load %arg3[%c0_4, %c0_5] : memref<16x32xf32, #tpu.memory_space<vmem>>, vector<16x32xf32>
    tpu.vector_store %arg3[%c0_4, %c0_5], %11 {strides = array<i32>} : memref<16x32xf32, #tpu.memory_space<vmem>>, vector<16x32xf32>,
    return
  }
  func.func @transform_0(%arg0: i32) -> (i32, i32) {
    %c0_i32 = arith.constant 0 : i32
    %c0_i32_0 = arith.constant 0 : i32
    %c0_i32_1 = arith.constant 0 : i32
    return %c0_i32, %c0_i32_0 : i32, i32
  }
  func.func @transform_1(%arg0: i32) -> (i32, i32) {
    %c0_i32 = arith.constant 0 : i32
    %c0_i32_0 = arith.constant 0 : i32
    return %arg0, %c0_i32 : i32, i32
  }
  func.func @transform_2(%arg0: i32) -> (i32, i32) {
    %c0_i32 = arith.constant 0 : i32
    %c0_i32_0 = arith.constant 0 : i32
    return %arg0, %c0_i32 : i32, i32
  }
}

</mosaic_0001>

<bundles_post_ra>
// kernel: tpu_custom_call.1
= control target key start
LH: loop header
LB: loop body
LE: loop exit
PB: predicated region body
PF: predicated region fallthrough
CT: control target
= control target key end

     0   :  { %8 = vsyncpa [#allocation4], 0  ;;  %s157_s0 = inlined_call_operand.<no memory space> [shape: f32[1,1], index: 0, kind: input, shape index: {}]   ;;  %s158_s1 = inlined_call_operand.hbm [shape: f32[16,32], index: 1, kind: input, shape index: {}]   ;;  %s159_s2 = inlined_call_operand.hbm [shape: f32[16,32], index: 2, kind: output, shape index: {}]  }
   0x1   :  { %9 = vsyncpa [#allocation5], 0  ;;  %s119_s9 = smov [#allocation3]  }
   0x2   :  { %s17_s10 = sshll.u32 %s119_s9, 4  ;;  %s18_s10 = int_to_ptr.vmem [resolvable:$true] %s17_s10 }
   0x3   :  { %s83_s11 = scalar_lea.vmem %s18_s10, 256  ;;  %p88_p1 = scmp.lt.s32.totalorder %s18_s10, %s18_s10 }
   0x4   :  { %p84_p0 = scmp.ne.s32.totalorder %s18_s10, %s83_s11  ;;  %p89_p2 = scmp.lt.s32.totalorder %s83_s11, %s83_s11 }
   0x6   :  { %p90_p3 = por %p89_p2, %p88_p1 }
   0x8   :  { %p91_p4 = pnand %p90_p3, %p84_p0 }
   0xa   :  { %94 = shalt.err (!%p91_p4)
}
   0xb   :  { %s120_s12 = smov 128   ;;  %s121_s13 = smov 8  }
   0xc   :  { %23 = dma.hbm_to_vmem [thread:$0]  %s158_s1, 256, %s18_s10, [#allocation4], %s120_s12, %s120_s12, %s121_s13  }
   0xd   :  { %115 = dma.done.wait [#allocation4], 256  }
   0xe   :  { %116 = vsyncadd [#allocation4], 4294967040  ;;  %v27_v0 = vld [vmem:[#allocation3] sm:$0xff]  ;;  %vm31_vm0 = vcmask 261120   ;;  %v28_v1 = vld [vmem:[#allocation3 + $0x8] sm:$0xff]  ;;  %v43_v10 = vstv %s157_s0  ;;  %s122_s17 = smov [#allocation6]  }
   0xf   :  { %v29_v2 = vmul.f32 %v27_v0, %v27_v0  ;;  %v30_v3 = vmul.f32 %v28_v1, %v28_v1  ;;  %s55_s18 = sshll.u32 %s122_s17, 4  ;;  %s56_s18 = int_to_ptr.vmem [resolvable:$true] %s55_s18 }
  0x10   :  { %s95_s19 = scalar_lea.vmem %s56_s18, 256  ;;  %p100_p6 = scmp.lt.s32.totalorder %s56_s18, %s56_s18 }
  0x11   :  { %v32_v4 = vsel %vm31_vm0, %v29_v2, 0.0  ;;  %v35_v5 = vsel %vm31_vm0, %v30_v3, 0.0  ;;  %p96_p5 = scmp.ne.s32.totalorder %s56_s18, %s95_s19  ;;  %p101_p7 = scmp.lt.s32.totalorder %s95_s19, %s95_s19 }
  0x12   :  { %33 = vadd.xlane.f32.xlu0 %v32_v4 }
  0x13   :  { %p102_p8 = por %p101_p7, %p100_p6 }
  0x15   :  { %p103_p9 = pnand %p102_p8, %p96_p5 }
  0x16   :  { %36 = vadd.xlane.f32.xlu0 %v35_v5 }
  0x9b   :  { %v34_v6 = vpop.xlane.xlu0 %33 }
  0x9c   :  { %v38_v7 = vmax.f32 %v34_v6, 1e-10 }
  0x9e   :  { %71 = vrsqrt.f32 %v38_v7 }
  0x9f   :  { %v37_v8 = vpop.xlane.xlu0 %36 }
  0xa0   :  { %v39_v9 = vmax.f32 %v37_v8, 1e-10 }
  0xa2   :  { %73 = vrsqrt.f32 %v39_v9 }
  0xab   :  { %v72_v11 = vpop.eup %71 }
  0xac   :  { %v44_v12 = vmul.f32 %v72_v11, %v43_v10 }
  0xae   :  { %v46_v13 = vmul.f32 %v44_v12, %v27_v0 }
  0xaf   :  { %v74_v14 = vpop.eup %73 }
  0xb0   :  { %v45_v15 = vmul.f32 %v74_v14, %v43_v10  ;;  %48 = vst.msk [vmem:[#allocation6] sm:$0xff] %vm31_vm0, %v46_v13 }
  0xb2   :  { %v47_v16 = vmul.f32 %v45_v15, %v28_v1 }
  0xb4   :  { %49 = vst.msk [vmem:[#allocation6 + $0x8] sm:$0xff] %vm31_vm0, %v47_v16 }
  0xb5   :  { %106 = shalt.err (!%p103_p9)
}
  0xb6   :  { %61 = dma.vmem_to_hbm [thread:$0]  %s56_s18, 256, %s159_s2, [#allocation5], %s120_s12, %s120_s12, %s121_s13  }
  0xb7   :  { %117 = dma.done.wait [#allocation5], 256  }
  0xb8   :  { %118 = vsyncadd [#allocation5], 4294967040 }
  0xb9   :  { %65 = vsyncpa [#allocation4], 1 }
  0xba   :  { %66 = vsyncpa [#allocation5], 1 }

</bundles_post_ra>
